<compile_context>
chip_gen: v5e
topology: v5e:2x2
jax: 0.10.0
libtpu: 0.0.40
codegen_flags: <defaults>
</compile_context>

<pallas_src>
import functools

import numpy as np
import jax
import jax.numpy as jnp
from jax.experimental import pallas as pl
from jax.experimental.pallas import tpu as pltpu


def _build_pe_table(d_model: int, max_seq_len: int) -> np.ndarray:
    """Deterministic sinusoidal table, identical to the PyTorch __init__."""
    pe = np.array(
        [
            [pos / np.power(10000, 2.0 * (j // 2) / d_model) for j in range(d_model)]
            for pos in range(max_seq_len)
        ]
    )
    pe[:, 0::2] = np.sin(pe[:, 0::2])
    pe[:, 1::2] = np.cos(pe[:, 1::2])
    pe = pe.astype(np.float32)
    pad_row = np.zeros((1, d_model), dtype=np.float32)
    return np.concatenate([pad_row, pe], axis=0)  # [max_seq_len + 1, d_model]


def _pe_kernel(len_ref, table_ref, emb_ref, *, d_model: int, tile_flat: int):
    # len_ref:   VMEM int32   [TB, 1]          (sequence lengths for this batch tile)
    # table_ref: VMEM float32 [1, tile_flat]   (flattened shifted PE table tile)
    # emb_ref:   VMEM         [TB, tile_flat]  (lane-dense flattened output tile)
    tb = emb_ref.shape[0]
    k = pl.program_id(0)  # tile index along the flattened (max_pos*d_model) axis (OUTER)

    # Loop-invariant local lane index (hoistable). Element with global flat index f
    # belongs to position f // d_model and is valid iff f < length * d_model.
    # Fold the per-step offset k*tile_flat into the tiny (TB, 1) bound instead of a
    # full-width add on the (TB, tile_flat) tensor.
    lane = jax.lax.broadcasted_iota(jnp.int32, (tb, tile_flat), 1)
    bound = len_ref[...] * d_model - k * tile_flat  # (TB, 1), broadcasts over lanes

    emb_ref[...] = jnp.where(lane < bound, table_ref[...], jnp.float32(0.0)).astype(
        emb_ref.dtype
    )


def _round_up(x: int, m: int) -> int:
    return ((x + m - 1) // m) * m


def _pick_tiles(B: int, flat: int):
    """Jointly pick (tile_flat, tb) so 2*(out_block + table_tile) stays <= ~28 MiB.

    28 MiB is safe under v7x's 32 MiB scoped-VMEM default (64 MiB physical per TC)
    and trivially safe on v5e/v6e (128 MiB). Output blocks end up 8-16 MiB for
    large problems, keeping the ~0.35 us/step pipeline overhead < 10%.
    """
    budget_elems = (28 * 1024 * 1024) // (2 * 4)  # (tb + 1) * tile_flat <= this

    # Flat-dim tile: take the whole flat axis when it comfortably fits (full-dim
    # blocks are exempt from the 128-lane divisibility rule); otherwise tile at a
    # 128-multiple and let a cdiv grid mask the ragged tail (no give-up fallback).
    if flat <= budget_elems // 2:
        tile_flat = flat
    else:
        tile_flat = max(128, ((budget_elems // 9) // 128) * 128)  # leaves room for tb>=8

    # Batch rows per step.
    tb_max = max(1, budget_elems // tile_flat - 1)
    if tb_max >= B:
        tb = B
    else:
        tb = min(max(8, (tb_max // 8) * 8), B)

    num_f = pl.cdiv(flat, tile_flat)
    num_b = pl.cdiv(B, tb)

    # v7x has 2 TensorCores: don't collapse to a 1x1 grid when there is enough
    # batch to split. (Neutral on single-TC v5e/v6e.)
    if num_f == 1 and num_b == 1 and B >= 16:
        tb = min(_round_up(pl.cdiv(B, 2), 8), B)
        num_b = pl.cdiv(B, tb)

    return tile_flat, tb, num_f, num_b


def positional_encoding_forward(input_len: jax.Array, table: jax.Array,
                                out_dtype=jnp.float32):
    """input_len: int [B]; table: float [max_seq_len + 1, d_model] (row 0 = pad)."""
    B = input_len.shape[0]
    max_pos = table.shape[0] - 1
    d_model = table.shape[1]
    flat = max_pos * d_model
    assert flat < 2**31, "flattened table too large for int32 lane indexing"

    table = table.astype(jnp.float32)
    tile_flat, tb, num_f_blocks, num_b_blocks = _pick_tiles(B, flat)

    lens = input_len.astype(jnp.int32)
    lens2 = lens.reshape(B, 1)

    # Drop the pad row and flatten; wrapper-side layout plumbing for a lane-dense store.
    table_flat = table[1:].reshape(1, flat)

    # Grid: flat axis OUTER (k), batch axis INNER (i) -> table tile stays VMEM-resident
    # across the batch sweep. Ragged last blocks (if any) are masked by Pallas.
    emb_flat = pl.pallas_call(
        functools.partial(_pe_kernel, d_model=d_model, tile_flat=tile_flat),
        out_shape=jax.ShapeDtypeStruct((B, flat), out_dtype),
        grid=(num_f_blocks, num_b_blocks),
        in_specs=[
            pl.BlockSpec((tb, 1), lambda k, i: (i, 0)),
            pl.BlockSpec((1, tile_flat), lambda k, i: (0, k)),
        ],
        out_specs=pl.BlockSpec((tb, tile_flat), lambda k, i: (i, k)),
        compiler_params=pltpu.CompilerParams(
            dimension_semantics=("parallel", "parallel"),
            vmem_limit_bytes=32 * 1024 * 1024,
        ),
    )(lens2, table_flat)

    emb = emb_flat.reshape(B, max_pos, d_model)

    # pos is a trivially cheap iota+where; computed outside the kernel so the kernel
    # has a single dense store stream. (int32 here vs PyTorch's int64.)
    j = jnp.arange(max_pos, dtype=jnp.int32)[None, :]
    pos = jnp.where(j < lens[:, None], j + 1, 0)
    return emb, pos


if __name__ == "__main__":
    D_MODEL = 32
    MAX_SEQ_LEN = 8
    BATCH = 2

    table_np = _build_pe_table(D_MODEL, MAX_SEQ_LEN)
    table = jnp.asarray(table_np)

    key = jax.random.PRNGKey(0)
    input_len = jax.random.randint(key, (BATCH,), 1, MAX_SEQ_LEN + 1, dtype=jnp.int32)

    emb, pos = positional_encoding_forward(input_len, table)
    emb = jax.block_until_ready(emb)
    pos = jax.block_until_ready(pos)

    # Pure-JAX reference check.
    j = jnp.arange(MAX_SEQ_LEN, dtype=jnp.int32)[None, :]       # [1, max_pos]
    pos_ref = jnp.where(j < input_len[:, None], j + 1, 0)        # [B, max_pos]
    emb_ref = table[pos_ref]                                     # [B, max_pos, d_model]

    assert pos.shape == (BATCH, MAX_SEQ_LEN)
    assert emb.shape == (BATCH, MAX_SEQ_LEN, D_MODEL)
    np.testing.assert_array_equal(np.asarray(pos), np.asarray(pos_ref))
    np.testing.assert_allclose(np.asarray(emb), np.asarray(emb_ref), rtol=1e-6, atol=1e-6)

    print("KERNEL_OK")
</pallas_src>

<mosaic_0001>
module attributes {stable_mosaic.version = 11 : i64} {
  func.func @_pe_kernel(%arg0: i32, %arg1: i32, %arg2: memref<2x1xi32, #tpu.memory_space<vmem>>, %arg3: memref<1x256xf32, #tpu.memory_space<vmem>>, %arg4: memref<2x256xf32, #tpu.memory_space<vmem>>) attributes {dimension_semantics = [#tpu.dimension_semantics<parallel>, #tpu.dimension_semantics<parallel>], iteration_bounds = array<i64: 1, 1>, scalar_prefetch = 0 : i64, scratch_operands = 0 : i64, tpu.core_type = #tpu.core_type<tc>, window_params = [{transform_indices = @transform_0, window_bounds = array<i64: 2, 1>}, {transform_indices = @transform_1, window_bounds = array<i64: 1, 256>}, {transform_indices = @transform_2, window_bounds = array<i64: 2, 256>}]} {
    %0 = tpu.iota {dimensions = array<i32: 1>} : vector<2x256xi32>
    %c0 = arith.constant 0 : index
    %c0_0 = arith.constant 0 : index
    %1 = vector.load %arg2[%c0, %c0_0] : memref<2x1xi32, #tpu.memory_space<vmem>>, vector<2x1xi32>
    %c32_i32 = arith.constant 32 : i32
    %2 = vector.broadcast %c32_i32 : i32 to vector<2x1xi32>
    %3 = arith.muli %1, %2 : vector<2x1xi32>
    %c256_i32 = arith.constant 256 : i32
    %4 = arith.muli %arg0, %c256_i32 : i32
    %5 = vector.broadcast %4 : i32 to vector<2x1xi32>
    %6 = arith.subi %3, %5 : vector<2x1xi32>
    %7 = vector.broadcast %6 : vector<2x1xi32> to vector<2x256xi32>
    %8 = arith.cmpi slt, %0, %7 : vector<2x256xi32>
    %c0_1 = arith.constant 0 : index
    %c0_2 = arith.constant 0 : index
    %9 = vector.load %arg3[%c0_1, %c0_2] : memref<1x256xf32, #tpu.memory_space<vmem>>, vector<1x256xf32>
    %cst = arith.constant 0.000000e+00 : f32
    %10 = vector.shape_cast %9 : vector<1x256xf32> to vector<1x256xf32>
    %11 = vector.broadcast %10 : vector<1x256xf32> to vector<2x256xf32>
    %12 = vector.broadcast %cst : f32 to vector<2x256xf32>
    %13 = arith.select %8, %11, %12 : vector<2x256xi1>, vector<2x256xf32>
    %c0_3 = arith.constant 0 : index
    %c0_4 = arith.constant 0 : index
    %14 = vector.load %arg4[%c0_3, %c0_4] : memref<2x256xf32, #tpu.memory_space<vmem>>, vector<2x256xf32>
    tpu.vector_store %arg4[%c0_3, %c0_4], %13 {strides = array<i32>} : memref<2x256xf32, #tpu.memory_space<vmem>>, vector<2x256xf32>,
    return
  }
  func.func @transform_0(%arg0: i32, %arg1: i32) -> (i32, i32) {
    %c0_i32 = arith.constant 0 : i32
    %c0_i32_0 = arith.constant 0 : i32
    return %arg1, %c0_i32 : i32, i32
  }
  func.func @transform_1(%arg0: i32, %arg1: i32) -> (i32, i32) {
    %c0_i32 = arith.constant 0 : i32
    %c0_i32_0 = arith.constant 0 : i32
    return %c0_i32, %arg0 : i32, i32
  }
  func.func @transform_2(%arg0: i32, %arg1: i32) -> (i32, i32) {
    %c0_i32 = arith.constant 0 : i32
    return %arg1, %arg0 : i32, i32
  }
}

</mosaic_0001>

<bundles_post_ra>
// kernel: tpu_custom_call.1
= control target key start
LH: loop header
LB: loop body
LE: loop exit
PB: predicated region body
PF: predicated region fallthrough
CT: control target
= control target key end

     0   :  { %v85_v1 = vmov 0   ;;  %s111_s0 = inlined_call_operand.vmem [shape: s32[2,1], index: 0, kind: input, shape index: {}]   ;;  %s112_s1 = inlined_call_operand.vmem [shape: f32[1,256], index: 1, kind: input, shape index: {}]   ;;  %s113_s2 = inlined_call_operand.hbm [shape: f32[2,256], index: 2, kind: output, shape index: {}]  }
   0x1   :  { %v15_v0 = vld [vmem:[%s111_s0] sm:$0x3]  ;;  %58 = vset.pattern.permute.xlu0 %v85_v1 }
   0x2   :  { %v16_v2 = vmul.u32 32, %v15_v0 }
   0x3   :  { %7 = vsyncpa [#allocation3], 0  ;;  %v12_v3 = vlaneseq  ;;  %v25_v5 = vld [vmem:[%s112_s1] sm:$0x3]  ;;  %s86_s13 = smov [#allocation2]   ;;  %s47_s16 = sshll.u32 %s113_s2, 4  ;;  %s48_s16 = int_to_ptr.hbm [resolvable:$true] %s47_s16 }
   0x4   :  { %21 = vperm.xlu0 %58, %v16_v2   ;;  %v28_v7 = vperm.slane %v25_v5, 1  ;;  %v27_v8 = vperm.slane %v25_v5, 0  ;;  %s45_s14 = sshll.u32 %s86_s13, 4  ;;  %vm36_vm2 = vcmask 1041408   ;;  %s46_s14 = int_to_ptr.vmem [resolvable:$true] %s45_s14 }
   0x5   :  { %v13_v4 = vand.u32 127, %v12_v3 }
   0x7   :  { %v14_v6 = vadd.s32 128, %v13_v4 }
  0x76   :  { %v22_v9 = vpop.permute.xlu0 %21 }
  0x77   :  { %vm23_vm0 = vcmp.lt.s32.totalorder %v13_v4, %v22_v9  ;;  %vm24_vm1 = vcmp.lt.s32.totalorder %v14_v6, %v22_v9 }
  0x78   :  { %v32_v10 = vsel %vm24_vm1, %v28_v7, 0.0  ;;  %v31_v12 = vsel %vm23_vm0, %v27_v8, 0.0 }
  0x79   :  { %v35_v11 = vrot.slane %v32_v10, 6 }
  0x7b   :  { %v37_v13 = vsel %vm36_vm2, %v31_v12, %v35_v11 }
  0x7c   :  { %39 = vst [vmem:[#allocation2] sm:$0xf] %v37_v13 }
  0x7d   :  { %50 = dma.vmem_to_hbm [thread:$0]  %s46_s14, 64, %s48_s16, [#allocation3]  }
  0x7e   :  { %83 = dma.done.wait [#allocation3], 64  }
  0x7f   :  { %84 = vsyncadd [#allocation3], 4294967232 }
  0x80   :  { %55 = vsyncpa [#allocation3], 1 }

</bundles_post_ra>
